<compile_context>
chip_gen: v7x
topology: tpu7x:2x2x1
jax: 0.10.0
libtpu: 0.0.40
codegen_flags: <defaults>
</compile_context>

<pallas_src>
import math

import jax
import jax.numpy as jnp
from jax import lax
from jax.experimental import pallas as pl
from jax.experimental.pallas import tpu as pltpu

LN_EPS = 1e-5  # nn.LayerNorm default eps


def _layernorm(x, gamma, beta):
    mean = jnp.mean(x, axis=-1, keepdims=True)
    cent = x - mean
    var = jnp.mean(cent * cent, axis=-1, keepdims=True)
    return cent * lax.rsqrt(var + LN_EPS) * gamma + beta


def _pick_tile(n, target):
    """Largest divisor of n that is <= target, preferring lane-dense multiples
    of 128, then sublane multiples of 8.  Falls back to the whole axis (which
    is always a legal block shape)."""
    target = max(int(target), 1)
    for align in (128, 8):
        cands = [d for d in range(align, n + 1, align)
                 if n % d == 0 and d <= target]
        if cands:
            return max(cands)
    # TODO(synk): pad + mask awkward compacted lengths (not a multiple of 8)
    # instead of falling back to a whole-axis tile.
    return n


def _itemsize(dtype):
    return jnp.finfo(dtype).bits // 8


# ---------------------------------------------------------------------------
# Pass 1: Q/K/V projections + shared qk LayerNorm (+ fold 1/sqrt(d) into Q).
# Runs once over the compacted sequence; outputs bf16 (or f32) intermediates.
# ---------------------------------------------------------------------------
def _make_proj_kernel(d, matmul_dtype):
    scale = 1.0 / math.sqrt(d)

    def _mm(a, b):
        return jnp.dot(a.astype(matmul_dtype), b.astype(matmul_dtype),
                       preferred_element_type=jnp.float32)

    def kernel(q_ref, k_ref, v_ref, wq_ref, wk_ref, wv_ref,
               gamma_ref, beta_ref, qn_ref, kn_ref, vp_ref):
        gamma = gamma_ref[...]                       # (1, D), f32
        beta = beta_ref[...]
        qp = _mm(q_ref[...], wq_ref[...])            # to_queries, f32 accum
        kp = _mm(k_ref[...], wk_ref[...])            # to_keys
        vp = _mm(v_ref[...], wv_ref[...])            # to_values
        qn_ref[...] = (_layernorm(qp, gamma, beta) * scale).astype(qn_ref.dtype)
        kn_ref[...] = _layernorm(kp, gamma, beta).astype(kn_ref.dtype)
        vp_ref[...] = vp.astype(vp_ref.dtype)

    return kernel


# ---------------------------------------------------------------------------
# Pass 2: flash attention over the compacted sequence + final feature softmax.
# grid = (batch, q-tile, k-tile); online softmax state in VMEM scratch.
# ---------------------------------------------------------------------------
def _make_flash_kernel(matmul_dtype):
    def kernel(q_ref, k_ref, v_ref, o_ref, m_ref, l_ref, acc_ref):
        ki = pl.program_id(2)

        @pl.when(ki == 0)
        def _init():
            m_ref[...] = jnp.full(m_ref.shape, -jnp.inf, jnp.float32)
            l_ref[...] = jnp.zeros(l_ref.shape, jnp.float32)
            acc_ref[...] = jnp.zeros(acc_ref.shape, jnp.float32)

        q = q_ref[...]                               # (tq, D), pre-scaled + LN'd
        k = k_ref[...]                               # (tk, D), LN'd
        s = lax.dot_general(q, k, (((1,), (1,)), ((), ())),
                            preferred_element_type=jnp.float32)  # (tq, tk)

        # Online (flash) softmax update.
        m_prev = m_ref[...]
        m_new = jnp.maximum(m_prev, jnp.max(s, axis=-1, keepdims=True))
        alpha = jnp.exp(m_prev - m_new)
        p = jnp.exp(s - m_new)
        l_ref[...] = alpha * l_ref[...] + jnp.sum(p, axis=-1, keepdims=True)
        acc_ref[...] = alpha * acc_ref[...] + jnp.dot(
            p.astype(matmul_dtype), v_ref[...].astype(matmul_dtype),
            preferred_element_type=jnp.float32)
        m_ref[...] = m_new

        @pl.when(ki == pl.num_programs(2) - 1)
        def _finalize():
            out = acc_ref[...] / l_ref[...]
            # nn.Dropout(0.1): identity in eval mode.
            # TODO(synk): training-mode dropout (pltpu PRNG mask) not implemented.
            # Final nn.Softmax over the feature dim, as in the module.
            mo = jnp.max(out, axis=-1, keepdims=True)
            e = jnp.exp(out - mo)
            out = e / jnp.sum(e, axis=-1, keepdims=True)
            o_ref[...] = out.astype(o_ref.dtype)

    return kernel


def segment_and_sparsify(x, segment_length, dilated_rate):
    b, l, d = x.shape
    x = x.reshape(b, l // segment_length, segment_length, d)
    x = x[:, :, ::dilated_rate]
    return x.reshape(b, -1, d)


def dilated_attention(q, k, v, wq, wk, wv, gamma, beta,
                      segment_length, dilated_rate, *,
                      block_q=512, block_k=512, block_proj=512,
                      matmul_dtype=jnp.bfloat16):
    B, L, D = q.shape
    S, R = segment_length, dilated_rate
    assert L % S == 0, "sequence length must be a multiple of segment_length"

    # Dilated sparsification (cheap strided slice); kernels only ever stream
    # the kept rows, so there is no R-times raw-block over-read in HBM.
    q_sel, k_sel, v_sel = (segment_and_sparsify(t, S, R) for t in (q, k, v))
    Lp = q_sel.shape[1]

    compute = matmul_dtype
    in_bytes = _itemsize(compute)
    out_bytes = q.dtype.itemsize

    # Streamed operands in the MXU dtype (halves HBM traffic when bf16).
    q_sel, k_sel, v_sel = (t.astype(compute) for t in (q_sel, k_sel, v_sel))
    # nn.Linear computes x @ W.T with W of shape (out, in); pre-transpose.
    wq_t, wk_t, wv_t = (w.T.astype(compute) for w in (wq, wk, wv))
    gamma2 = gamma.reshape(1, D).astype(jnp.float32)
    beta2 = beta.reshape(1, D).astype(jnp.float32)

    # ---------------- Pass 1: projections + shared LayerNorm ----------------
    tr = _pick_tile(Lp, block_proj)
    nr = Lp // tr
    row_spec = pl.BlockSpec((None, tr, D), lambda b, i: (b, i, 0))
    w_spec = pl.BlockSpec((D, D), lambda b, i: (0, 0))
    vec_spec = pl.BlockSpec((1, D), lambda b, i: (0, 0))
    proj_vmem = int(1.5 * (2 * 3 * tr * D * in_bytes       # q/k/v (dbl-buffered)
                           + 2 * 3 * D * D * in_bytes      # weights
                           + 2 * 2 * D * 4                 # gamma/beta
                           + 2 * 3 * tr * D * in_bytes))   # outputs
    qn, kn, vp = pl.pallas_call(
        _make_proj_kernel(D, compute),
        out_shape=(jax.ShapeDtypeStruct((B, Lp, D), compute),) * 3,
        grid_spec=pltpu.PrefetchScalarGridSpec(
            num_scalar_prefetch=0,
            grid=(B, nr),
            in_specs=[row_spec, row_spec, row_spec,
                      w_spec, w_spec, w_spec,
                      vec_spec, vec_spec],
            out_specs=[row_spec, row_spec, row_spec],
        ),
        compiler_params=pltpu.CompilerParams(
            dimension_semantics=("parallel", "parallel"),
            vmem_limit_bytes=max(8 << 20, min(96 << 20, proj_vmem)),
        ),
    )(q_sel, k_sel, v_sel, wq_t, wk_t, wv_t, gamma2, beta2)

    # ------------- Pass 2: flash attention + final feature softmax ----------
    tq = _pick_tile(Lp, block_q)
    tk = _pick_tile(Lp, block_k)
    nq, nk = Lp // tq, Lp // tk
    q_spec = pl.BlockSpec((None, tq, D), lambda b, qi, ki: (b, qi, 0))
    kv_spec = pl.BlockSpec((None, tk, D), lambda b, qi, ki: (b, ki, 0))
    out_spec = pl.BlockSpec((None, tq, D), lambda b, qi, ki: (b, qi, 0))
    flash_vmem = int(1.5 * (2 * tq * D * in_bytes           # q tile
                            + 2 * 2 * tk * D * in_bytes     # k/v tiles
                            + 2 * tq * D * out_bytes        # output
                            + tq * D * 4 + 2 * tq * 4))     # f32 scratch
    return pl.pallas_call(
        _make_flash_kernel(compute),
        out_shape=jax.ShapeDtypeStruct((B, Lp, D), q.dtype),
        grid_spec=pltpu.PrefetchScalarGridSpec(
            num_scalar_prefetch=0,
            grid=(B, nq, nk),
            in_specs=[q_spec, kv_spec, kv_spec],
            out_specs=out_spec,
            scratch_shapes=[
                pltpu.VMEM((tq, 1), jnp.float32),   # running max m
                pltpu.VMEM((tq, 1), jnp.float32),   # running denom l
                pltpu.VMEM((tq, D), jnp.float32),   # output accumulator
            ],
        ),
        compiler_params=pltpu.CompilerParams(
            dimension_semantics=("parallel", "parallel", "arbitrary"),
            vmem_limit_bytes=max(8 << 20, min(96 << 20, flash_vmem)),
        ),
    )(qn, kn, vp)


def _reference(q, k, v, wq, wk, wv, gamma, beta, segment_length, dilated_rate):
    """Pure-JAX reference mirroring the PyTorch forward (eval mode)."""
    q, k, v = (segment_and_sparsify(t, segment_length, dilated_rate)
               for t in (q, k, v))
    qp, kp, vp = q @ wq.T, k @ wk.T, v @ wv.T

    def ln(x):
        mu = x.mean(-1, keepdims=True)
        var = ((x - mu) ** 2).mean(-1, keepdims=True)
        return (x - mu) / jnp.sqrt(var + LN_EPS) * gamma + beta

    qn, kn = ln(qp), ln(kp)
    s = jnp.einsum('bqd,bkd->bqk', qn, kn) / math.sqrt(q.shape[-1])
    attn = jax.nn.softmax(s, axis=-1)
    out = jnp.einsum('bqk,bkd->bqd', attn, vp)
    return jax.nn.softmax(out, axis=-1)


if __name__ == "__main__":
    BATCH = 8
    SEQ = 32
    DIM = 64
    SEGMENT_LENGTH = 8
    DILATED_RATE = 2

    key = jax.random.PRNGKey(0)
    kq, kk, kv, kwq, kwk, kwv = jax.random.split(key, 6)

    Q = jax.random.normal(kq, (BATCH, SEQ, DIM), dtype=jnp.float32)
    K = jax.random.normal(kk, (BATCH, SEQ, DIM), dtype=jnp.float32)
    V = jax.random.normal(kv, (BATCH, SEQ, DIM), dtype=jnp.float32)

    # Deterministic parameter init (nn.Linear-like scale; LayerNorm default).
    w_scale = 1.0 / math.sqrt(DIM)
    Wq = jax.random.normal(kwq, (DIM, DIM), dtype=jnp.float32) * w_scale
    Wk = jax.random.normal(kwk, (DIM, DIM), dtype=jnp.float32) * w_scale
    Wv = jax.random.normal(kwv, (DIM, DIM), dtype=jnp.float32) * w_scale
    gamma = jnp.ones((DIM,), dtype=jnp.float32)
    beta = jnp.zeros((DIM,), dtype=jnp.float32)

    ref = _reference(Q, K, V, Wq, Wk, Wv, gamma, beta,
                     SEGMENT_LENGTH, DILATED_RATE)

    # f32 matmuls + small flash tiles: exercises the multi-(q,k)-tile online
    # softmax accumulation path (grid = (8, 2, 2)) with a tight tolerance.
    out_f32 = dilated_attention(Q, K, V, Wq, Wk, Wv, gamma, beta,
                                SEGMENT_LENGTH, DILATED_RATE,
                                block_q=8, block_k=8,
                                matmul_dtype=jnp.float32)
    out_f32 = jax.block_until_ready(out_f32)
    assert out_f32.shape == ref.shape
    err_f32 = float(jnp.max(jnp.abs(out_f32 - ref)))
    assert jnp.allclose(out_f32, ref, atol=3e-3, rtol=3e-3), err_f32

    # Default fast path: bf16 streamed operands / MXU inputs, f32 accumulation.
    out_bf16 = dilated_attention(Q, K, V, Wq, Wk, Wv, gamma, beta,
                                 SEGMENT_LENGTH, DILATED_RATE)
    out_bf16 = jax.block_until_ready(out_bf16)
    assert out_bf16.shape == ref.shape
    err_bf16 = float(jnp.max(jnp.abs(out_bf16 - ref)))
    assert jnp.allclose(out_bf16, ref, atol=5e-2, rtol=5e-2), err_bf16

    print("KERNEL_OK")
</pallas_src>

<mosaic_0001>
module attributes {stable_mosaic.version = 11 : i64} {
  func.func @kernel(%arg0: i32, %arg1: i32, %arg2: memref<1x16x64xf32, #tpu.memory_space<vmem>>, %arg3: memref<1x16x64xf32, #tpu.memory_space<vmem>>, %arg4: memref<1x16x64xf32, #tpu.memory_space<vmem>>, %arg5: memref<64x64xf32, #tpu.memory_space<vmem>>, %arg6: memref<64x64xf32, #tpu.memory_space<vmem>>, %arg7: memref<64x64xf32, #tpu.memory_space<vmem>>, %arg8: memref<1x64xf32, #tpu.memory_space<vmem>>, %arg9: memref<1x64xf32, #tpu.memory_space<vmem>>, %arg10: memref<1x16x64xf32, #tpu.memory_space<vmem>>, %arg11: memref<1x16x64xf32, #tpu.memory_space<vmem>>, %arg12: memref<1x16x64xf32, #tpu.memory_space<vmem>>) attributes {dimension_semantics = [#tpu.dimension_semantics<parallel>, #tpu.dimension_semantics<parallel>], iteration_bounds = array<i64: 8, 1>, scalar_prefetch = 0 : i64, scratch_operands = 0 : i64, tpu.core_type = #tpu.core_type<tc>, window_params = [{transform_indices = @transform_0, window_bounds = array<i64: 1, 16, 64>}, {transform_indices = @transform_1, window_bounds = array<i64: 1, 16, 64>}, {transform_indices = @transform_2, window_bounds = array<i64: 1, 16, 64>}, {pipeline_mode = #tpu.pipeline_mode<synchronous>, transform_indices = @transform_3, window_bounds = array<i64: 64, 64>}, {pipeline_mode = #tpu.pipeline_mode<synchronous>, transform_indices = @transform_4, window_bounds = array<i64: 64, 64>}, {pipeline_mode = #tpu.pipeline_mode<synchronous>, transform_indices = @transform_5, window_bounds = array<i64: 64, 64>}, {pipeline_mode = #tpu.pipeline_mode<synchronous>, transform_indices = @transform_6, window_bounds = array<i64: 1, 64>}, {pipeline_mode = #tpu.pipeline_mode<synchronous>, transform_indices = @transform_7, window_bounds = array<i64: 1, 64>}, {transform_indices = @transform_8, window_bounds = array<i64: 1, 16, 64>}, {transform_indices = @transform_9, window_bounds = array<i64: 1, 16, 64>}, {transform_indices = @transform_10, window_bounds = array<i64: 1, 16, 64>}]} {
    %c0 = arith.constant 0 : index
    %c0_0 = arith.constant 0 : index
    %0 = vector.load %arg8[%c0, %c0_0] : memref<1x64xf32, #tpu.memory_space<vmem>>, vector<1x64xf32>
    %c0_1 = arith.constant 0 : index
    %c0_2 = arith.constant 0 : index
    %1 = vector.load %arg9[%c0_1, %c0_2] : memref<1x64xf32, #tpu.memory_space<vmem>>, vector<1x64xf32>
    %c0_3 = arith.constant 0 : index
    %c0_4 = arith.constant 0 : index
    %c0_5 = arith.constant 0 : index
    %2 = vector.load %arg2[%c0_3, %c0_4, %c0_5] : memref<1x16x64xf32, #tpu.memory_space<vmem>>, vector<1x16x64xf32>
    %3 = vector.shape_cast %2 : vector<1x16x64xf32> to vector<16x64xf32>
    %c0_6 = arith.constant 0 : index
    %c0_7 = arith.constant 0 : index
    %4 = vector.load %arg5[%c0_6, %c0_7] : memref<64x64xf32, #tpu.memory_space<vmem>>, vector<64x64xf32>
    %cst = arith.constant dense<0.000000e+00> : vector<16x64xf32>
    %5 = tpu.matmul %3, %4, %cst {dimension_numbers = #tpu.dot_dimension_numbers<[1], [0], [0], [1], [0, 0, 1, 1], [], []>} : vector<16x64xf32>, vector<64x64xf32>, vector<16x64xf32> -> vector<16x64xf32>
    %c0_8 = arith.constant 0 : index
    %c0_9 = arith.constant 0 : index
    %c0_10 = arith.constant 0 : index
    %6 = vector.load %arg3[%c0_8, %c0_9, %c0_10] : memref<1x16x64xf32, #tpu.memory_space<vmem>>, vector<1x16x64xf32>
    %7 = vector.shape_cast %6 : vector<1x16x64xf32> to vector<16x64xf32>
    %c0_11 = arith.constant 0 : index
    %c0_12 = arith.constant 0 : index
    %8 = vector.load %arg6[%c0_11, %c0_12] : memref<64x64xf32, #tpu.memory_space<vmem>>, vector<64x64xf32>
    %cst_13 = arith.constant dense<0.000000e+00> : vector<16x64xf32>
    %9 = tpu.matmul %7, %8, %cst_13 {dimension_numbers = #tpu.dot_dimension_numbers<[1], [0], [0], [1], [0, 0, 1, 1], [], []>} : vector<16x64xf32>, vector<64x64xf32>, vector<16x64xf32> -> vector<16x64xf32>
    %c0_14 = arith.constant 0 : index
    %c0_15 = arith.constant 0 : index
    %c0_16 = arith.constant 0 : index
    %10 = vector.load %arg4[%c0_14, %c0_15, %c0_16] : memref<1x16x64xf32, #tpu.memory_space<vmem>>, vector<1x16x64xf32>
    %11 = vector.shape_cast %10 : vector<1x16x64xf32> to vector<16x64xf32>
    %c0_17 = arith.constant 0 : index
    %c0_18 = arith.constant 0 : index
    %12 = vector.load %arg7[%c0_17, %c0_18] : memref<64x64xf32, #tpu.memory_space<vmem>>, vector<64x64xf32>
    %cst_19 = arith.constant dense<0.000000e+00> : vector<16x64xf32>
    %13 = tpu.matmul %11, %12, %cst_19 {dimension_numbers = #tpu.dot_dimension_numbers<[1], [0], [0], [1], [0, 0, 1, 1], [], []>} : vector<16x64xf32>, vector<64x64xf32>, vector<16x64xf32> -> vector<16x64xf32>
    %cst_20 = arith.constant dense<0.000000e+00> : vector<16xf32>
    %14 = vector.multi_reduction <add>, %5, %cst_20 [1] : vector<16x64xf32> to vector<16xf32>
    %15 = vector.shape_cast %14 : vector<16xf32> to vector<16x1xf32>
    %cst_21 = arith.constant 6.400000e+01 : f32
    %16 = vector.broadcast %cst_21 : f32 to vector<16x1xf32>
    %17 = arith.divf %15, %16 : vector<16x1xf32>
    %18 = vector.broadcast %17 : vector<16x1xf32> to vector<16x64xf32>
    %19 = arith.subf %5, %18 : vector<16x64xf32>
    %20 = arith.mulf %19, %19 : vector<16x64xf32>
    %cst_22 = arith.constant dense<0.000000e+00> : vector<16xf32>
    %21 = vector.multi_reduction <add>, %20, %cst_22 [1] : vector<16x64xf32> to vector<16xf32>
    %22 = vector.shape_cast %21 : vector<16xf32> to vector<16x1xf32>
    %cst_23 = arith.constant 6.400000e+01 : f32
    %23 = vector.broadcast %cst_23 : f32 to vector<16x1xf32>
    %24 = arith.divf %22, %23 : vector<16x1xf32>
    %cst_24 = arith.constant 9.99999974E-6 : f32
    %25 = vector.broadcast %cst_24 : f32 to vector<16x1xf32>
    %26 = arith.addf %24, %25 : vector<16x1xf32>
    %27 = math.rsqrt %26 : vector<16x1xf32>
    %28 = vector.broadcast %27 : vector<16x1xf32> to vector<16x64xf32>
    %29 = arith.mulf %19, %28 : vector<16x64xf32>
    %30 = vector.broadcast %0 : vector<1x64xf32> to vector<16x64xf32>
    %31 = arith.mulf %29, %30 : vector<16x64xf32>
    %32 = vector.broadcast %1 : vector<1x64xf32> to vector<16x64xf32>
    %33 = arith.addf %31, %32 : vector<16x64xf32>
    %cst_25 = arith.constant 1.250000e-01 : f32
    %34 = vector.broadcast %cst_25 : f32 to vector<16x64xf32>
    %35 = arith.mulf %33, %34 : vector<16x64xf32>
    %c0_26 = arith.constant 0 : index
    %c0_27 = arith.constant 0 : index
    %c0_28 = arith.constant 0 : index
    %36 = vector.load %arg10[%c0_26, %c0_27, %c0_28] : memref<1x16x64xf32, #tpu.memory_space<vmem>>, vector<1x16x64xf32>
    %37 = vector.shape_cast %36 : vector<1x16x64xf32> to vector<16x64xf32>
    %38 = vector.shape_cast %35 : vector<16x64xf32> to vector<1x16x64xf32>
    tpu.vector_store %arg10[%c0_26, %c0_27, %c0_28], %38 {strides = array<i32>} : memref<1x16x64xf32, #tpu.memory_space<vmem>>, vector<1x16x64xf32>,
    %cst_29 = arith.constant dense<0.000000e+00> : vector<16xf32>
    %39 = vector.multi_reduction <add>, %9, %cst_29 [1] : vector<16x64xf32> to vector<16xf32>
    %40 = vector.shape_cast %39 : vector<16xf32> to vector<16x1xf32>
    %cst_30 = arith.constant 6.400000e+01 : f32
    %41 = vector.broadcast %cst_30 : f32 to vector<16x1xf32>
    %42 = arith.divf %40, %41 : vector<16x1xf32>
    %43 = vector.broadcast %42 : vector<16x1xf32> to vector<16x64xf32>
    %44 = arith.subf %9, %43 : vector<16x64xf32>
    %45 = arith.mulf %44, %44 : vector<16x64xf32>
    %cst_31 = arith.constant dense<0.000000e+00> : vector<16xf32>
    %46 = vector.multi_reduction <add>, %45, %cst_31 [1] : vector<16x64xf32> to vector<16xf32>
    %47 = vector.shape_cast %46 : vector<16xf32> to vector<16x1xf32>
    %cst_32 = arith.constant 6.400000e+01 : f32
    %48 = vector.broadcast %cst_32 : f32 to vector<16x1xf32>
    %49 = arith.divf %47, %48 : vector<16x1xf32>
    %cst_33 = arith.constant 9.99999974E-6 : f32
    %50 = vector.broadcast %cst_33 : f32 to vector<16x1xf32>
    %51 = arith.addf %49, %50 : vector<16x1xf32>
    %52 = math.rsqrt %51 : vector<16x1xf32>
    %53 = vector.broadcast %52 : vector<16x1xf32> to vector<16x64xf32>
    %54 = arith.mulf %44, %53 : vector<16x64xf32>
    %55 = vector.broadcast %0 : vector<1x64xf32> to vector<16x64xf32>
    %56 = arith.mulf %54, %55 : vector<16x64xf32>
    %57 = vector.broadcast %1 : vector<1x64xf32> to vector<16x64xf32>
    %58 = arith.addf %56, %57 : vector<16x64xf32>
    %c0_34 = arith.constant 0 : index
    %c0_35 = arith.constant 0 : index
    %c0_36 = arith.constant 0 : index
    %59 = vector.load %arg11[%c0_34, %c0_35, %c0_36] : memref<1x16x64xf32, #tpu.memory_space<vmem>>, vector<1x16x64xf32>
    %60 = vector.shape_cast %59 : vector<1x16x64xf32> to vector<16x64xf32>
    %61 = vector.shape_cast %58 : vector<16x64xf32> to vector<1x16x64xf32>
    tpu.vector_store %arg11[%c0_34, %c0_35, %c0_36], %61 {strides = array<i32>} : memref<1x16x64xf32, #tpu.memory_space<vmem>>, vector<1x16x64xf32>,
    %c0_37 = arith.constant 0 : index
    %c0_38 = arith.constant 0 : index
    %c0_39 = arith.constant 0 : index
    %62 = vector.load %arg12[%c0_37, %c0_38, %c0_39] : memref<1x16x64xf32, #tpu.memory_space<vmem>>, vector<1x16x64xf32>
    %63 = vector.shape_cast %62 : vector<1x16x64xf32> to vector<16x64xf32>
    %64 = vector.shape_cast %13 : vector<16x64xf32> to vector<1x16x64xf32>
    tpu.vector_store %arg12[%c0_37, %c0_38, %c0_39], %64 {strides = array<i32>} : memref<1x16x64xf32, #tpu.memory_space<vmem>>, vector<1x16x64xf32>,
    return
  }
  func.func @transform_0(%arg0: i32, %arg1: i32) -> (i32, i32, i32) {
    %c0_i32 = arith.constant 0 : i32
    %c0_i32_0 = arith.constant 0 : i32
    return %arg0, %arg1, %c0_i32 : i32, i32, i32
  }
  func.func @transform_1(%arg0: i32, %arg1: i32) -> (i32, i32, i32) {
    %c0_i32 = arith.constant 0 : i32
    %c0_i32_0 = arith.constant 0 : i32
    return %arg0, %arg1, %c0_i32 : i32, i32, i32
  }
  func.func @transform_2(%arg0: i32, %arg1: i32) -> (i32, i32, i32) {
    %c0_i32 = arith.constant 0 : i32
    %c0_i32_0 = arith.constant 0 : i32
    return %arg0, %arg1, %c0_i32 : i32, i32, i32
  }
  func.func @transform_3(%arg0: i32, %arg1: i32) -> (i32, i32) {
    %c0_i32 = arith.constant 0 : i32
    %c0_i32_0 = arith.constant 0 : i32
    %c0_i32_1 = arith.constant 0 : i32
    return %c0_i32, %c0_i32_0 : i32, i32
  }
  func.func @transform_4(%arg0: i32, %arg1: i32) -> (i32, i32) {
    %c0_i32 = arith.constant 0 : i32
    %c0_i32_0 = arith.constant 0 : i32
    %c0_i32_1 = arith.constant 0 : i32
    return %c0_i32, %c0_i32_0 : i32, i32
  }
  func.func @transform_5(%arg0: i32, %arg1: i32) -> (i32, i32) {
    %c0_i32 = arith.constant 0 : i32
    %c0_i32_0 = arith.constant 0 : i32
    %c0_i32_1 = arith.constant 0 : i32
    return %c0_i32, %c0_i32_0 : i32, i32
  }
  func.func @transform_6(%arg0: i32, %arg1: i32) -> (i32, i32) {
    %c0_i32 = arith.constant 0 : i32
    %c0_i32_0 = arith.constant 0 : i32
    %c0_i32_1 = arith.constant 0 : i32
    return %c0_i32, %c0_i32_0 : i32, i32
  }
  func.func @transform_7(%arg0: i32, %arg1: i32) -> (i32, i32) {
    %c0_i32 = arith.constant 0 : i32
    %c0_i32_0 = arith.constant 0 : i32
    %c0_i32_1 = arith.constant 0 : i32
    return %c0_i32, %c0_i32_0 : i32, i32
  }
  func.func @transform_8(%arg0: i32, %arg1: i32) -> (i32, i32, i32) {
    %c0_i32 = arith.constant 0 : i32
    %c0_i32_0 = arith.constant 0 : i32
    return %arg0, %arg1, %c0_i32 : i32, i32, i32
  }
  func.func @transform_9(%arg0: i32, %arg1: i32) -> (i32, i32, i32) {
    %c0_i32 = arith.constant 0 : i32
    %c0_i32_0 = arith.constant 0 : i32
    return %arg0, %arg1, %c0_i32 : i32, i32, i32
  }
  func.func @transform_10(%arg0: i32, %arg1: i32) -> (i32, i32, i32) {
    %c0_i32 = arith.constant 0 : i32
    %c0_i32_0 = arith.constant 0 : i32
    return %arg0, %arg1, %c0_i32 : i32, i32, i32
  }
}

</mosaic_0001>

<bundles_post_ra>
// kernel: tpu_custom_call.1
= control target key start
LH: loop header
LB: loop body
LE: loop exit
PB: predicated region body
PF: predicated region fallthrough
CT: control target
= control target key end

     0   :  { %s2416_s0 = inlined_call_operand.hbm [shape: f32[8,16,64], index: 0, kind: input, shape index: {}]   ;;  %s2417_s1 = inlined_call_operand.hbm [shape: f32[8,16,64], index: 1, kind: input, shape index: {}]   ;;  %s2418_s2 = inlined_call_operand.hbm [shape: f32[8,16,64], index: 2, kind: input, shape index: {}]   ;;  %s2419_s3 = inlined_call_operand.hbm [shape: f32[64,64], index: 3, kind: input, shape index: {}]   ;;  %s2420_s4 = inlined_call_operand.hbm [shape: f32[64,64], index: 4, kind: input, shape index: {}]   ;;  %s2421_s5 = inlined_call_operand.hbm [shape: f32[64,64], index: 5, kind: input, shape index: {}]   ;;  %s2422_s6 = inlined_call_operand.vmem [shape: f32[1,64], index: 6, kind: input, shape index: {}]   ;;  %s2423_s7 = inlined_call_operand.vmem [shape: f32[1,64], index: 7, kind: input, shape index: {}]   ;;  %s2424_s8 = inlined_call_operand.hbm [shape: f32[8,16,64], index: 8, kind: output, shape index: {0}]   ;;  %s2425_s9 = inlined_call_operand.hbm [shape: f32[8,16,64], index: 9, kind: output, shape index: {1}]   ;;  %s2426_s10 = inlined_call_operand.hbm [shape: f32[8,16,64], index: 10, kind: output, shape index: {2}]  }
   0x1   :  { %2456 = sst [smem:[#allocation31_spill]] %s2417_s1 }
   0x2   :  { %2457 = sst [smem:[#allocation32_spill]] %s2419_s3 }
   0x3   :  { %2458 = sst [smem:[#allocation33_spill]] %s2423_s7 }
   0x4   :  { %2459 = sst [smem:[#allocation34_spill]] %s2424_s8 }
   0x5   :  { %2460 = sst [smem:[#allocation35_spill]] %s2425_s9 }
   0x6   :  { %2461 = sst [smem:[#allocation36_spill]] %s2426_s10 }
   0x7   :  { %16 = vsyncpa [#allocation3], 0 }
   0x8   :  { %18 = vsyncpa [#allocation3 + $0x1], 0 }
   0x9   :  { %19 = vsyncpa [#allocation6], 0 }
   0xa   :  { %21 = vsyncpa [#allocation6 + $0x1], 0 }
   0xb   :  { %22 = vsyncpa [#allocation9], 0 }
   0xc   :  { %23 = vsyncpa [#allocation12], 0 }
   0xd   :  { %24 = vsyncpa [#allocation4], 0 }
   0xe   :  { %26 = vsyncpa [#allocation4 + $0x1], 0 }
   0xf   :  { %27 = vsyncpa [#allocation15], 0 }
  0x10   :  { %29 = vsyncpa [#allocation15 + $0x1], 0  ;;  %s1913_s13 = smov 0   ;;  %s1915_s14 = smov 0  }
  0x11   :  { %s1917_s15 = smov 0   ;;  %s1919_s16 = smov 0  }
  0x12   :  { %s1921_s17 = smov 0   ;;  %s1923_s18 = smov 0  }
  0x13 LB: > { %2462 = sst [smem:[#allocation23_spill]] %s1823_s13  ;;  %s1944_s19 = sadd.s32 4294967295, %s1843_s18   ;;  %s1843_s18 = sphi %s1923_s18, %s35_s18   ;;  %s1839_s17 = sphi %s1921_s17, %s2512_s17   ;;  %s1835_s16 = sphi %s1919_s16, %s2511_s16   ;;  %s1831_s15 = sphi %s1917_s15, %s2515_s15   ;;  %s1827_s14 = sphi %s1915_s14, %s2514_s14   ;;  %s1823_s13 = sphi %s1913_s13, %s2513_s13  }
  0x14   : > { %2463 = sst [smem:[#allocation24_spill]] %s1835_s16  ;;  %s2427_s20 = sadd.s32 4294967294, %s1843_s18  }
  0x15   : > { %2464 = sst [smem:[#allocation25_spill]] %s1839_s17  ;;  %p63_p0 = scmp.ne.s32.totalorder %s1831_s15, %s1827_s14 }
  0x16   : > { %2465 = sst [smem:[#allocation26_spill]] %s1843_s18  ;;  %p64_p1 = scmp.eq.s32.totalorder %s1843_s18, 0 }
  0x17   : > { %p69_p2 = scmp.ne.s32.totalorder %s1827_s14, %s1823_s13  ;;  %p2432_p3 = scmp.eq.s32.totalorder %s1944_s19, 0 }
  0x18   : > { %p1953_p4 = por %p64_p1, %p63_p0  ;;  %p256_p5 = scmp.eq.s32.totalorder %s1944_s19, 7 }
  0x19   : > { %p1960_p6 = por %p2432_p3, %p69_p2  ;;  %p262_p7 = scmp.eq.s32.totalorder %s2427_s20, 7 }
  0x1a   : > { %s2466_s21 = scalar_select %p1953_p4, 1, 0 }
  0x1b   : > { %s2467_s22 = scalar_select %p1960_p6, 1, 0 }
  0x1c   : > { %p1966_p8 = por %p256_p5, %p63_p0  ;;  %p1206_p9 = scmp.ge.s32.totalorder %s1843_s18, 1 }
  0x1d   : > { %p1971_p10 = por %p262_p7, %p69_p2  ;;  %p325_p11 = scmp.lt.s32.totalorder %s1843_s18, 9 }
  0x1e   : > { %s2468_s23 = scalar_select %p1966_p8, 1, 0 }
  0x1f   : > { %s2470_s24 = scalar_select %p1971_p10, 1, 0 }
  0x20   : > { %2469 = sst [smem:[#allocation27_spill]] %s2468_s23  ;;  %p1976_p12 = pnand %p1206_p9, %p325_p11 }
  0x21   : > { %2471 = sst [smem:[#allocation28_spill]] %s2470_s24  ;;  %s1845_s26 = smov [#allocation8]  }
  0x22   : > { %s2472_s25 = scalar_select %p1976_p12, 1, 0 }
  0x23   : > { %s337_s27 = sshll.u32 %s1845_s26, 4  ;;  %p1414_p13 = pneg %p1976_p12  ;;  %s338_s27 = int_to_ptr.vmem [resolvable:$true] %s337_s27 }
  0x24   : > { %s47_s29 = sadd.s32 1, %s1839_s17  ;;  %s2475_s3 = sld [smem:[#allocation32_spill]] }
  0x25   : > { %p1984_p0 = pnand %p1414_p13, %p2432_p3  ;;  %p1990_p1 = scmp.ge.s32.totalorder %s47_s29, 8 }
  0x27   : > { %s2473_s28 = scalar_select %p1984_p0, 1, 0 }
  0x28   : > { %s2474_s11 = scalar_select %p1990_p1, 1, 0 }
  0x29   : > { %p2002_p5 = pneg %p1984_p0 }
  0x2a   : > { %s1515_s24 = scalar_lea.hbm %s2475_s3, 1024 }
  0x2b   : > { %p1516_p2 = scmp.ne.s32.totalorder %s2475_s3, %s1515_s24  ;;  %p1522_p11 = scmp.lt.u32.totalorder %s1515_s24, %s2475_s3 }
  0x2c   : > { %s2476_s10 = scalar_select %p2002_p5, 1, 0 }
  0x2d   : > { %p1518_p7 = pnand %p2002_p5, %p1516_p2 }
  0x2f   : > { %p1519_p9 = pneg %p1518_p7 }
  0x31   : > { %p1524_p13 = pnand %p1522_p11, %p1519_p9 }
  0x33   : > { %1527 = shalt.err (!%p1524_p13)
}
  0x34   : > { %s1528_s20 = scalar_lea.vmem %s338_s27, 1024  ;;  %p1536_p6 = scmp.lt.s32.totalorder %s338_s27, %s338_s27 }
  0x35   : > { %p1529_p3 = scmp.ne.s32.totalorder %s338_s27, %s1528_s20  ;;  %p1537_p12 = scmp.lt.s32.totalorder %s1528_s20, %s1528_s20 }
  0x37   : > { %p1531_p10 = pnand %p1529_p3, %p2002_p5  ;;  %p1538_p4 = por %p1537_p12, %p1536_p6 }
  0x39   : > { %p1532_p8 = pneg %p1531_p10 }
  0x3b   : > { %p1539_p1 = pnand %p1538_p4, %p1532_p8 }
  0x3d   : > { %1542 = shalt.err (!%p1539_p1)
}
  0x3e   : > { %s2439_s13 = smov 128   ;;  %s2442_s9 = smov 8  }
  0x3f   : > { %1417 = dma.hbm_to_vmem [thread:$0]  (!%p1984_p0), %s2475_s3, 1024, %s338_s27, [#allocation9], %s2439_s13, %s2439_s13, %s2442_s9  }
  0x40   : > { %p2477_p3 = scmp.ne.s32.totalorder %s2474_s11, 0  ;;  %p1447_p4 = scmp.lt.s32.totalorder %s1843_s18, 8 }
  0x41   : > { %s2441_s12 = sand.u32 1, %s1831_s15   ;;  %s2034_s8 = sshll.u32 %s1839_s17, 8 }
  0x42   : > { %s2517_s29 = smov (%p2477_p3, %s47_s29), 0  ;;  %s2031_s20 = sshll.u32 %s2441_s12, 4 }
  0x43   : > { %2478 = sst [smem:[#allocation29_spill]] %s2517_s29  ;;  %s51_s26 = ssub.s32 %s1839_s17, %s2517_s29 }
  0x44   : > { %p54_p6 = scmp.eq.s32.totalorder %s51_s26, 0  ;;  %p2479_p8 = scmp.ne.s32.totalorder %s2466_s21, 0 }
  0x45   : > { %s406_s27 = sand.u32 1, %s1843_s18   ;;  %s2481_s11 = sadd.s32 1, %s1831_s15 }
  0x46   : > { %p2038_p10 = pnand %p1447_p4, %p2479_p8  ;;  %s2483_s1 = sld [smem:[#allocation31_spill]] }
  0x47   : > { %s2046_s24 = scalar_select %p54_p6, %s1831_s15, %s2481_s11  }
  0x48   : > { %s2480_s23 = scalar_select %p2038_p10, 1, 0 }
  0x49   : > { %2482 = sst [smem:[#allocation30_spill]] %s2046_s24  ;;  %s410_s21 = scalar_lea.vmem [#allocation5], %s2031_s20 }
  0x4a   : > { %s419_s26 = sshll.u32 %s410_s21, 4  ;;  %s1848_s9 = smov [#allocation10]   ;;  %s2055_s26 = int_to_ptr.vmem [resolvable:$true] %s419_s26 }
  0x4b   : > { %s2057_s3 = sshll.u32 %s1848_s9, 4  ;;  %s2059_s29 = scalar_lea.sflag [#allocation6], %s406_s27  ;;  %s351_s3 = int_to_ptr.vmem [resolvable:$true] %s2057_s3 }
  0x4c   : > { %s2052_s12 = scalar_lea.hbm %s2483_s1, %s2034_s8  ;;  %p2065_p1 = pneg %p2038_p10 }
  0x4d   : > { %s1543_s11 = scalar_lea.hbm %s2052_s12, 256  ;;  %s1548_s17 = scalar_lea.hbm %s2483_s1, 2048 }
  0x4e   : > { %p1544_p12 = scmp.ne.s32.totalorder %s2052_s12, %s1543_s11  ;;  %p1549_p9 = scmp.lt.u32.totalorder %s2052_s12, %s2483_s1 }
  0x4f   : > { %s2484_s13 = scalar_select %p2065_p1, 1, 0 }
  0x50   : > { %p1546_p2 = pnand %p2065_p1, %p1544_p12  ;;  %p1550_p11 = scmp.lt.u32.totalorder %s1548_s17, %s1543_s11 }
  0x51   : > { %p1552_p3 = scmp.lt.u32.totalorder %s1543_s11, %s2052_s12 }
  0x52   : > { %p1547_p7 = pneg %p1546_p2  ;;  %p1551_p13 = por %p1550_p11, %p1549_p9 }
  0x54   : > { %p1553_p4 = por %p1552_p3, %p1551_p13 }
  0x56   : > { %p1554_p6 = pnand %p1553_p4, %p1547_p7 }
  0x58   : > { %1557 = shalt.err (!%p1554_p6)
}
  0x59   : > { %s1558_s27 = scalar_lea.vmem %s2055_s26, 256  ;;  %s1849_s30 = smov [#allocation5]  }
  0x5a   : > { %p1559_p8 = scmp.ne.s32.totalorder %s2055_s26, %s1558_s27  ;;  %s1563_s21 = sshll.u32 %s1849_s30, 4  ;;  %s1564_s21 = int_to_ptr.vmem [resolvable:$false] %s1563_s21 }
  0x5b   : > { %s1565_s24 = scalar_lea.vmem %s1564_s21, 512  ;;  %p1566_p0 = scmp.lt.s32.totalorder %s2055_s26, %s1564_s21 }
  0x5c   : > { %p1561_p12 = pnand %p1559_p8, %p2065_p1  ;;  %p1567_p5 = scmp.lt.s32.totalorder %s1565_s24, %s1558_s27 }
  0x5e   : > { %p1562_p2 = pneg %p1561_p12  ;;  %p1568_p9 = por %p1567_p5, %p1566_p0 }
  0x60   : > { %p1569_p11 = pnand %p1568_p9, %p1562_p2 }
  0x62   : > { %1572 = shalt.err (!%p1569_p11)
}
  0x63   : > { %s2485_s17 = smov 8   ;;  %s2486_s11 = smov 128  }
  0x64   : > { %1430 = dma.hbm_to_vmem [thread:$0]  (!%p2038_p10), %s2052_s12, 256, %s2055_s26, %s2059_s29, %s2486_s11, %s2486_s11, %s2485_s17  }
  0x65   : > { %s1573_s21 = scalar_lea.hbm %s2420_s4, 1024  ;;  %p2487_p5 = scmp.ne.s32.totalorder %s2476_s10, 0 }
  0x66   : > { %p1574_p0 = scmp.ne.s32.totalorder %s2420_s4, %s1573_s21  ;;  %p1580_p3 = scmp.lt.u32.totalorder %s1573_s21, %s2420_s4 }
  0x68   : > { %p1576_p7 = pnand %p1574_p0, %p2487_p5 }
  0x6a   : > { %p1577_p13 = pneg %p1576_p7 }
  0x6c   : > { %p1582_p4 = pnand %p1580_p3, %p1577_p13 }
  0x6e   : > { %1585 = shalt.err (!%p1582_p4)
}
  0x6f   : > { %s1586_s7 = scalar_lea.vmem %s351_s3, 1024  ;;  %p1594_p2 = scmp.lt.s32.totalorder %s351_s3, %s351_s3 }
  0x70   : > { %p1587_p6 = scmp.ne.s32.totalorder %s351_s3, %s1586_s7  ;;  %p1595_p9 = scmp.lt.s32.totalorder %s1586_s7, %s1586_s7 }
  0x72   : > { %p1589_p8 = pnand %p1587_p6, %p2487_p5  ;;  %p1596_p11 = por %p1595_p9, %p1594_p2 }
  0x74   : > { %p1590_p12 = pneg %p1589_p8 }
  0x76   : > { %p1597_p10 = pnand %p1596_p11, %p1590_p12 }
  0x78   : > { %1600 = shalt.err (!%p1597_p10)
}
  0x79   : > { %p2488_p0 = scmp.ne.s32.totalorder %s2473_s28, 0  ;;  %s1850_s12 = smov [#allocation11]  }
  0x7a   : > { %s363_s26 = sshll.u32 %s1850_s12, 4  ;;  %s1601_s7 = scalar_lea.hbm %s2421_s5, 1024  ;;  %s364_s26 = int_to_ptr.vmem [resolvable:$true] %s363_s26 }
  0x7b   : > { %1420 = dma.hbm_to_vmem [thread:$0]  (!%p2488_p0), %s2420_s4, 1024, %s351_s3, [#allocation9], %s2486_s11, %s2486_s11, %s2485_s17  }
  0x7c   : > { %p1602_p10 = scmp.ne.s32.totalorder %s2421_s5, %s1601_s7  ;;  %p1608_p3 = scmp.lt.u32.totalorder %s1601_s7, %s2421_s5 }
  0x7e   : > { %p1604_p7 = pnand %p1602_p10, %p2487_p5 }
  0x80   : > { %p1605_p13 = pneg %p1604_p7 }
  0x82   : > { %p1610_p4 = pnand %p1608_p3, %p1605_p13 }
  0x84   : > { %1613 = shalt.err (!%p1610_p4)
}
  0x85   : > { %s1614_s3 = scalar_lea.vmem %s364_s26, 1024  ;;  %p1622_p2 = scmp.lt.s32.totalorder %s364_s26, %s364_s26 }
  0x86   : > { %p1615_p6 = scmp.ne.s32.totalorder %s364_s26, %s1614_s3  ;;  %p1623_p9 = scmp.lt.s32.totalorder %s1614_s3, %s1614_s3 }
  0x88   : > { %p1617_p8 = pnand %p1615_p6, %p2487_p5  ;;  %p1624_p11 = por %p1623_p9, %p1622_p2 }
  0x8a   : > { %p1618_p12 = pneg %p1617_p8 }
  0x8c   : > { %p1625_p1 = pnand %p1624_p11, %p1618_p12 }
  0x8e   : > { %1628 = shalt.err (!%p1625_p1)
}
  0x8f   : > { %1423 = dma.hbm_to_vmem [thread:$0]  (!%p2488_p0), %s2421_s5, 1024, %s364_s26, [#allocation12], %s2486_s11, %s2486_s11, %s2485_s17  }
  0x90   : > { %s2139_s12 = scalar_lea.hbm %s2416_s0, %s2034_s8  ;;  %s387_s28 = scalar_lea.vmem [#allocation2], %s2031_s20 }
  0x91   : > { %s396_s9 = sshll.u32 %s387_s28, 4  ;;  %s2489_s30 = sand.u32 1, %s1831_s15   ;;  %s2142_s9 = int_to_ptr.vmem [resolvable:$true] %s396_s9 }
  0x92   : > { %s2146_s7 = scalar_lea.sflag [#allocation3], %s2489_s30  ;;  %s1629_s21 = scalar_lea.hbm %s2139_s12, 256 }
  0x93   : > { %p1630_p1 = scmp.ne.s32.totalorder %s2139_s12, %s1629_s21  ;;  %p2490_p5 = scmp.ne.s32.totalorder %s2484_s13, 0 }
  0x94   : > { %s1634_s24 = scalar_lea.hbm %s2416_s0, 2048  ;;  %p1635_p7 = scmp.lt.u32.totalorder %s2139_s12, %s2416_s0 }
  0x95   : > { %p1632_p0 = pnand %p1630_p1, %p2490_p5  ;;  %p1636_p13 = scmp.lt.u32.totalorder %s1634_s24, %s1629_s21 }
  0x96   : > { %p1638_p4 = scmp.lt.u32.totalorder %s1629_s21, %s2139_s12 }
  0x97   : > { %p1633_p10 = pneg %p1632_p0  ;;  %p1637_p3 = por %p1636_p13, %p1635_p7 }
  0x99   : > { %p1639_p6 = por %p1638_p4, %p1637_p3 }
  0x9b   : > { %p1640_p8 = pnand %p1639_p6, %p1633_p10 }
  0x9d   : > { %1643 = shalt.err (!%p1640_p8)
}
  0x9e   : > { %s1644_s1 = scalar_lea.vmem %s2142_s9, 256  ;;  %s1851_s10 = smov [#allocation2]  }
  0x9f   : > { %p1645_p12 = scmp.ne.s32.totalorder %s2142_s9, %s1644_s1  ;;  %s1649_s18 = sshll.u32 %s1851_s10, 4  ;;  %s1650_s18 = int_to_ptr.vmem [resolvable:$false] %s1649_s18 }
  0xa0   : > { %s1651_s28 = scalar_lea.vmem %s1650_s18, 512  ;;  %p1652_p11 = scmp.lt.s32.totalorder %s2142_s9, %s1650_s18 }
  0xa1   : > { %p1647_p2 = pnand %p1645_p12, %p2490_p5  ;;  %p1653_p1 = scmp.lt.s32.totalorder %s1651_s28, %s1644_s1 }
  0xa3   : > { %p1648_p9 = pneg %p1647_p2  ;;  %p1654_p0 = por %p1653_p1, %p1652_p11 }
  0xa5   : > { %p1655_p7 = pnand %p1654_p0, %p1648_p9 }
  0xa7   : > { %1658 = shalt.err (!%p1655_p7)
}
  0xa8   : > { %p2491_p10 = scmp.ne.s32.totalorder %s2480_s23, 0  ;;  %s2177_s26 = scalar_lea.hbm %s2418_s2, %s2034_s8 }
  0xa9   : > { %s433_s27 = scalar_lea.vmem [#allocation7], %s2031_s20  ;;  %s1659_s3 = scalar_lea.hbm %s2177_s26, 256 }
  0xaa   : > { %1427 = dma.hbm_to_vmem [thread:$0]  (!%p2491_p10), %s2139_s12, 256, %s2142_s9, %s2146_s7, %s2486_s11, %s2486_s11, %s2485_s17  }
  0xab   : > { %s442_s24 = sshll.u32 %s433_s27, 4  ;;  %p1660_p13 = scmp.ne.s32.totalorder %s2177_s26, %s1659_s3  ;;  %s2180_s24 = int_to_ptr.vmem [resolvable:$true] %s442_s24 }
  0xac   : > { %s1664_s9 = scalar_lea.hbm %s2418_s2, 2048  ;;  %p1665_p6 = scmp.lt.u32.totalorder %s2177_s26, %s2418_s2 }
  0xad   : > { %p1662_p3 = pnand %p1660_p13, %p2490_p5  ;;  %p1666_p8 = scmp.lt.u32.totalorder %s1664_s9, %s1659_s3 }
  0xae   : > { %p1668_p2 = scmp.lt.u32.totalorder %s1659_s3, %s2177_s26 }
  0xaf   : > { %p1663_p4 = pneg %p1662_p3  ;;  %p1667_p12 = por %p1666_p8, %p1665_p6 }
  0xb1   : > { %p1669_p9 = por %p1668_p2, %p1667_p12 }
  0xb3   : > { %p1670_p11 = pnand %p1669_p9, %p1663_p4 }
  0xb5   : > { %1673 = shalt.err (!%p1670_p11)
}
  0xb6   : > { %s1674_s20 = scalar_lea.vmem %s2180_s24, 256  ;;  %s1852_s1 = smov [#allocation7]  }
  0xb7   : > { %p1675_p1 = scmp.ne.s32.totalorder %s2180_s24, %s1674_s20  ;;  %s1679_s10 = sshll.u32 %s1852_s1, 4  ;;  %s1680_s10 = int_to_ptr.vmem [resolvable:$false] %s1679_s10 }
  0xb8   : > { %s1681_s18 = scalar_lea.vmem %s1680_s10, 512  ;;  %p1682_p13 = scmp.lt.s32.totalorder %s2180_s24, %s1680_s10 }
  0xb9   : > { %p1677_p0 = pnand %p1675_p1, %p2490_p5  ;;  %p1683_p3 = scmp.lt.s32.totalorder %s1681_s18, %s1674_s20 }
  0xbb   : > { %p1678_p7 = pneg %p1677_p0  ;;  %p1684_p6 = por %p1683_p3, %p1682_p13 }
  0xbd   : > { %p1685_p8 = pnand %p1684_p6, %p1678_p7 }
  0xbf   : > { %1688 = shalt.err (!%p1685_p8)
}
  0xc0   : > { %1433 = dma.hbm_to_vmem [thread:$0]  (!%p2491_p10), %s2177_s26, 256, %s2180_s24, %s2059_s29, %s2486_s11, %s2486_s11, %s2485_s17  }
  0xc1   : > { %p2492_p5 = scmp.ne.s32.totalorder %s2472_s25, 0 }
  0xc2   : > { %s2210_s13 = sand.u32 (!%p2492_p5), 1, %s1827_s14   ;;  %p2493_p4 = scmp.ne.s32.totalorder (!%p2492_p5), %s2467_s22, 0 }
  0xc3   : > { %454 = sbr.rel (%p2492_p5) target bundleno = 823 (0x337), region = 52  ;;  %s2213_s28 = sshll.u32 (!%p2492_p5), %s2210_s13, 4 }
  0xc4   : > { %s457_s23 = scalar_lea.sflag (!%p2492_p5), [#allocation3], %s2210_s13  ;;  %s460_s30 = scalar_lea.vmem (!%p2492_p5), [#allocation2], %s2213_s28 }
  0xca   : > { %1798 = dma.done.wait (%p2493_p4), %s457_s23, 256  }
  0xcb   : > { %1800 = vsyncadd (%p2493_p4), %s457_s23, 4294967040  ;;  %s465_s25 = sand.u32 1, %s1944_s19   ;;  %s469_s17 = scalar_lea.vmem [#allocation5], %s2213_s28 }
  0xcc   : > { %s466_s29 = scalar_lea.sflag [#allocation6], %s465_s25 }
  0xcd   : > { %1802 = dma.done.wait (%p2493_p4), %s466_s29, 512  }
  0xce   : > { %1804 = vsyncadd (%p2493_p4), %s466_s29, 4294966784  ;;  %s478_s11 = scalar_lea.vmem [#allocation7], %s2213_s28  ;;  %p2494_p10 = scmp.eq.s32.totalorder %s1944_s19, 0 }
  0xd0   : > { %1806 = dma.done.wait (%p2494_p10), [#allocation9], 2048   ;;  %p2495_p12 = pmov %p2494_p10 }
  0xd1   : > { %p2496_p2 = pmov %p2494_p10 }
  0xd2   : > { %1808 = vsyncadd (%p2495_p12), [#allocation9], 4294965248 }
  0xd3   : > { %1810 = dma.done.wait (%p2496_p2), [#allocation12], 1024   ;;  %p2497_p9 = pmov %p2496_p2 }
  0xd4   : > { %v557_v0 = vld [vmem:[#allocation8] sm:$0xff]  ;;  %v558_v1 = vld [vmem:[#allocation8 + $0x8] sm:$0xff]  ;;  %v559_v5 = vld [vmem:[#allocation8 + $0x10] sm:$0xff]  ;;  %vm565_vm0 = vcmask 523264   ;;  %s2265_s22 = scalar_lea.vmem [#allocation16], %s2213_s28  ;;  %s2498_s27 = sld [smem:[#allocation24_spill]] }
  0xd5   : > { %1812 = vsyncadd (%p2497_p9), [#allocation12], 4294966272  ;;  %v649_v2 = vld [vmem:[#allocation10] sm:$0xff]  ;;  %v1342_v3 = vpack.c.bf16 %v558_v1, %v557_v0  ;;  %v650_v4 = vld [vmem:[#allocation10 + $0x8] sm:$0xff]  ;;  %s2499_s16 = sld [smem:[#allocation33_spill]]  ;;  %s972_s12 = sshll.u32 %s2265_s22, 4  ;;  %s2278_s12 = int_to_ptr.vmem [resolvable:$true] %s972_s12 }
  0xd6   : > { %v560_v6 = vld [vmem:[#allocation8 + $0x18] sm:$0xff]  ;;  %v1358_v7 = vpack.c.bf16 %v650_v4, %v649_v2  ;;  %v651_v9 = vld [vmem:[#allocation10 + $0x10] sm:$0xff]  ;;  %v561_v11 = vld [vmem:[#allocation8 + $0x20] sm:$0xff]  ;;  %s532_s7 = scalar_lea.vmem [#allocation13], %s2213_s28  ;;  %s2500_s20 = sld [smem:[#allocation27_spill]] }
  0xd7   : > { %v1346_v8 = vpack.c.bf16 %v560_v6, %v559_v5  ;;  %v652_v10 = vld [vmem:[#allocation10 + $0x18] sm:$0xff]  ;;  %1343 = vmatprep.subr.bf16.mxu0 %v1342_v3  ;;  %v562_v13 = vld [vmem:[#allocation8 + $0x28] sm:$0xff]  ;;  %v653_v14 = vld [vmem:[#allocation10 + $0x20] sm:$0xff]  ;;  %s936_s8 = sshll.u32 %s532_s7, 4  ;;  %s2284_s1 = scalar_lea.vmem [#allocation14], %s2213_s28  ;;  %s2292_s8 = int_to_ptr.vmem [resolvable:$true] %s936_s8 }
  0xd8   : > { %v1362_v12 = vpack.c.bf16 %v652_v10, %v651_v9  ;;  %v654_v15 = vld [vmem:[#allocation10 + $0x28] sm:$0xff]  ;;  %1359 = vmatprep.subr.bf16.mxu1 %v1358_v7  ;;  %1345 = vmatpush3.bf16.msra.mxu0 %v1342_v3  ;;  %v1350_v16 = vpack.c.bf16 %v562_v13, %v561_v11  ;;  %v555_v17 = vld [vmem:[%s460_s30] sm:$0xff]  ;;  %v564_v21 = vld [vmem:[#allocation8 + $0x38] sm:$0xff]  ;;  %s954_s10 = sshll.u32 %s2284_s1, 4  ;;  %s911_s3 = scalar_lea.sflag [#allocation4], %s2210_s13  ;;  %s2301_s10 = int_to_ptr.vmem [resolvable:$true] %s954_s10 }
  0xd9   : > { %1361 = vmatpush3.bf16.msra.mxu1 %v1358_v7  ;;  %1347 = vmatprep.subr.bf16.mxu0 %v1346_v8  ;;  %v647_v18 = vld [vmem:[%s469_s17] sm:$0xff]  ;;  %v1366_v19 = vpack.c.bf16 %v654_v15, %v653_v14  ;;  %v656_v23 = vld [vmem:[#allocation10 + $0x38] sm:$0xff]  ;;  %v741_v29 = vld [vmem:[#allocation11 + $0x8] sm:$0xff]  ;;  %s1853_s18 = smov [#allocation13]  }
  0xda   : > { %1363 = vmatprep.subr.bf16.mxu1 %v1362_v12  ;;  %v563_v20 = vld [vmem:[#allocation8 + $0x30] sm:$0xff]  ;;  %1301 = vmatprep.mubr.msk.f32.mxu0 %vm565_vm0, %v555_v17  ;;  %v556_v26 = vld [vmem:[%s460_s30 + $0x8] sm:$0xff]  ;;  %v740_v28 = vld [vmem:[#allocation11] sm:$0xff]  ;;  %s1252_s9 = sshll.u32 %s2498_s27, 8  ;;  %s2501_s30 = sld [smem:[#allocation34_spill]] }
  0xdb   : > { %v655_v22 = vld [vmem:[#allocation10 + $0x30] sm:$0xff]  ;;  %1320 = vmatprep.mubr.msk.f32.mxu1 %vm565_vm0, %v647_v18  ;;  %v1354_v24 = vpack.c.bf16 %v564_v21, %v563_v20  ;;  %v648_v27 = vld [vmem:[%s469_s17 + $0x8] sm:$0xff]  ;;  %v1374_v31 = vpack.c.bf16 %v741_v29, %v740_v28  ;;  %v744_v34 = vld [vmem:[#allocation11 + $0x20] sm:$0xff]  ;;  %s2503_s27 = sld [smem:[#allocation36_spill]]  ;;  %s1693_s23 = sshll.u32 %s1853_s18, 4  ;;  %s1694_s23 = int_to_ptr.vmem [resolvable:$false] %s1693_s23 }
  0xdc   : > { %1349 = vmatpush3.bf16.msra.mxu0 %v1346_v8  ;;  %v1370_v25 = vpack.c.bf16 %v656_v23, %v655_v22  ;;  %v742_v30 = vld [vmem:[#allocation11 + $0x10] sm:$0xff]  ;;  %v743_v32 = vld [vmem:[#allocation11 + $0x18] sm:$0xff]  ;;  %v745_v35 = vld [vmem:[#allocation11 + $0x28] sm:$0xff]  ;;  %p2504_p1 = scmp.ne.s32.totalorder %s2500_s20, 0  ;;  %s1695_s17 = scalar_lea.vmem %s1694_s23, 512 }
  0xdd   : > { %1365 = vmatpush3.bf16.msra.mxu1 %v1362_v12  ;;  %1351 = vmatprep.subr.bf16.mxu0 %v1350_v16  ;;  %v1378_v33 = vpack.c.bf16 %v743_v32, %v742_v30  ;;  %v738_v36 = vld [vmem:[%s478_s11] sm:$0xff]  ;;  %v1382_v37 = vpack.c.bf16 %v745_v35, %v744_v34  ;;  %v747_v39 = vld [vmem:[#allocation11 + $0x38] sm:$0xff]  ;;  %p1696_p13 = scmp.lt.s32.totalorder %s2292_s8, %s1694_s23 }
  0xde   : > { %1367 = vmatprep.subr.bf16.mxu1 %v1366_v19  ;;  %v746_v38 = vld [vmem:[#allocation11 + $0x30] sm:$0xff]  ;;  %v739_v41 = vld [vmem:[%s478_s11 + $0x8] sm:$0xff]  ;;  %v1236_v21 = vld [vmem:[%s2422_s6] ss:$0 sm:$0xff]  ;;  %s2502_s11 = sld [smem:[#allocation35_spill]] }
  0xdf   : > { %v1386_v40 = vpack.c.bf16 %v747_v39, %v746_v38  ;;  %v1237_v23 = vld [vmem:[%s2499_s16] ss:$0 sm:$0xff]  ;;  %s1689_s16 = scalar_lea.vmem %s2292_s8, 256 }
  0xe0   : > { %1353 = vmatpush3.bf16.msra.mxu0 %v1350_v16  ;;  %s2290_s29 = scalar_lea.hbm %s2501_s30, %s1252_s9  ;;  %p1690_p11 = scmp.ne.s32.totalorder %s2292_s8, %s1689_s16 }
  0xe1   : > { %1369 = vmatpush3.bf16.msra.mxu1 %v1366_v19  ;;  %1355 = vmatprep.subr.bf16.mxu0 %v1354_v24  ;;  %s2307_s24 = scalar_lea.hbm %s2503_s27, %s1252_s9  ;;  %p1697_p3 = scmp.lt.s32.totalorder %s1695_s17, %s1689_s16 }
  0xe2   : > { %1371 = vmatprep.subr.bf16.mxu1 %v1370_v25  ;;  %p1691_p0 = pnand %p1690_p11, %p2504_p1 }
  0xe3   : > { %p1698_p6 = por %p1697_p3, %p1696_p13 }
  0xe4   : > { %1357 = vmatpush3.bf16.msra.mxu0 %v1354_v24  ;;  %p1692_p7 = pneg %p1691_p0 }
  0xe5   : > { %1373 = vmatpush3.bf16.msra.mxu1 %v1370_v25  ;;  %1375 = vmatprep.subr.bf16.mxu0 %v1374_v31 }
  0xe6   : > { %p1699_p8 = pnand %p1698_p6, %p1692_p7 }
  0xe7   : > { %1302 = vmatmul.mubr.msk.f32.vlgmr.msra.gmra.mrb[0].mxu0 %vm565_vm0, %v556_v26 }
  0xe8   : > { %1321 = vmatmul.mubr.msk.f32.vlgmr.msra.gmra.mrb[0].mxu1 %vm565_vm0, %v648_v27  ;;  %1339 = vmatprep.mubr.msk.f32.mxu0 %vm565_vm0, %v738_v36 }
  0xe9   : > { %1377 = vmatpush3.bf16.msra.mxu0 %v1374_v31 }
  0xea   : > { %1379 = vmatprep.subr.bf16.mxu0 %v1378_v33 }
  0xed   : > { %1381 = vmatpush3.bf16.msra.mxu0 %v1378_v33 }
  0xee   : > { %1383 = vmatprep.subr.bf16.mxu0 %v1382_v37 }
  0xf1   : > { %1385 = vmatpush3.bf16.msra.mxu0 %v1382_v37 }
  0xf2   : > { %1387 = vmatprep.subr.bf16.mxu0 %v1386_v40 }
  0xf5   : > { %1389 = vmatpush3.bf16.msra.mxu0 %v1386_v40 }
  0xf8   : > { %1340 = vmatmul.mubr.msk.f32.vlgmr.msra.gmra.mrb[2].mxu0 %vm565_vm0, %v739_v41 }
 0x1ba   : > { %v1303_v42 = vpop.f32.mrb[0].mxu0 }
 0x1bb   : > { %v1322_v43 = vpop.f32.mrb[0].mxu1  ;;  %v638_v44 = vpop.f32.mrb[1].mxu0  ;;  %v832_v49 = vsel %vm565_vm0, %v1303_v42, 0.0 }
 0x1bc   : > { %v729_v45 = vpop.f32.mrb[1].mxu1  ;;  %v829_v46 = vsel %vm565_vm0, %v638_v44, 0.0  ;;  %v879_v48 = vsel %vm565_vm0, %v1322_v43, 0.0 }
 0x1bd   : > { %v876_v47 = vsel %vm565_vm0, %v729_v45, 0.0  ;;  %830 = vadd.xlane.f32.xlu0 %v829_v46 }
 0x1be   : > { %877 = vadd.xlane.f32.xlu1 %v876_v47 }
 0x1c1   : > { %833 = vadd.xlane.f32.xlu0 %v832_v49 }
 0x1c2   : > { %880 = vadd.xlane.f32.xlu1 %v879_v48 }
 0x1cb   : > { %v1341_v6 = vpop.f32.mrb[2].mxu0 }
 0x1cc   : > { %909 = vst.msk [vmem:[%s2265_s22 + $0x8] sm:$0xff] %vm565_vm0, %v1341_v6  ;;  %v820_v7 = vpop.f32.mrb[3].mxu0 }
 0x1cd   : > { %908 = vst.msk [vmem:[%s2265_s22] sm:$0xff] %vm565_vm0, %v820_v7  ;;  %s2299_s22 = scalar_lea.hbm %s2502_s11, %s1252_s9 }
 0x24a   : > { %v831_v50 = vpop.xlane.xlu0 %830 }
 0x24b   : > { %v878_v51 = vpop.xlane.xlu1 %877  ;;  %v836_v52 = vmul.f32 0.015625, %v831_v50 }
 0x24c   : > { %v882_v53 = vmul.f32 0.015625, %v878_v51 }
 0x24d   : > { %v838_v54 = vsub.f32 %v638_v44, %v836_v52 }
 0x24e   : > { %v884_v55 = vsub.f32 %v729_v45, %v882_v53  ;;  %v834_v56 = vpop.xlane.xlu0 %833 }
 0x24f   : > { %v881_v57 = vpop.xlane.xlu1 %880  ;;  %v837_v58 = vmul.f32 0.015625, %v834_v56  ;;  %v840_v59 = vmul.f32 %v838_v54, %v838_v54 }
 0x250   : > { %v883_v60 = vmul.f32 0.015625, %v881_v57  ;;  %v886_v63 = vmul.f32 %v884_v55, %v884_v55 }
 0x251   : > { %v839_v61 = vsub.f32 %v1303_v42, %v837_v58  ;;  %v842_v62 = vsel %vm565_vm0, %v840_v59, 0.0 }
 0x252   : > { %v885_v0 = vsub.f32 %v1322_v43, %v883_v60  ;;  %843 = vadd.xlane.f32.xlu0 %v842_v62  ;;  %v888_v2 = vsel %vm565_vm0, %v886_v63, 0.0 }
 0x253   : > { %v841_v1 = vmul.f32 %v839_v61, %v839_v61 }
 0x254   : > { %v887_v4 = vmul.f32 %v885_v0, %v885_v0 }
 0x255   : > { %v845_v3 = vsel %vm565_vm0, %v841_v1, 0.0 }
 0x256   : > { %889 = vadd.xlane.f32.xlu0 %v888_v2  ;;  %846 = vadd.xlane.f32.xlu1 %v845_v3  ;;  %v891_v5 = vsel %vm565_vm0, %v887_v4, 0.0 }
 0x25a   : > { %892 = vadd.xlane.f32.xlu1 %v891_v5 }
 0x2df   : > { %v844_v8 = vpop.xlane.xlu0 %843 }
 0x2e0   : > { %v848_v9 = vmul.f32 0.015625, %v844_v8 }
 0x2e2   : > { %v850_v10 = vadd.f32 1e-05, %v848_v9 }
 0x2e3   : > { %v847_v11 = vpop.xlane.xlu1 %846  ;;  %v890_v12 = vpop.xlane.xlu0 %889 }
 0x2e4   : > { %1507 = vrsqrt.f32 %v850_v10  ;;  %v849_v13 = vmul.f32 0.015625, %v847_v11  ;;  %v894_v14 = vmul.f32 0.015625, %v890_v12 }
 0x2e6   : > { %v851_v15 = vadd.f32 1e-05, %v849_v13  ;;  %v896_v16 = vadd.f32 1e-05, %v894_v14 }
 0x2e7   : > { %v893_v17 = vpop.xlane.xlu1 %892 }
 0x2e8   : > { %1509 = vrsqrt.f32 %v851_v15  ;;  %v895_v18 = vmul.f32 0.015625, %v893_v17 }
 0x2e9   : > { %1511 = vrsqrt.f32 %v896_v16 }
 0x2ea   : > { %v897_v19 = vadd.f32 1e-05, %v895_v18 }
 0x2ec   : > { %1513 = vrsqrt.f32 %v897_v19 }
 0x2ee   : > { %v1508_v20 = vpop.eup %1507 }
 0x2ef   : > { %v854_v22 = vmul.f32 %v1508_v20, %v838_v54 }
 0x2f1   : > { %v862_v24 = vmul.f32 %v1236_v21, %v854_v22 }
 0x2f2   : > { %v1510_v25 = vpop.eup %1509 }
 0x2f3   : > { %v1512_v26 = vpop.eup %1511  ;;  %v870_v27 = vadd.f32 %v1237_v23, %v862_v24  ;;  %v855_v28 = vmul.f32 %v1510_v25, %v839_v61 }
 0x2f4   : > { %v900_v29 = vmul.f32 %v1512_v26, %v884_v55 }
 0x2f5   : > { %v872_v30 = vmul.f32 0.125, %v870_v27  ;;  %v863_v31 = vmul.f32 %v1236_v21, %v855_v28 }
 0x2f6   : > { %v1514_v32 = vpop.eup %1513  ;;  %v902_v33 = vmul.f32 %v1236_v21, %v900_v29 }
 0x2f7   : > { %v871_v34 = vadd.f32 %v1237_v23, %v863_v31  ;;  %v901_v35 = vmul.f32 %v1514_v32, %v885_v0  ;;  %874 = vst.msk [vmem:[%s532_s7] sm:$0xff] %vm565_vm0, %v872_v30 }
 0x2f8   : > { %v904_v36 = vadd.f32 %v1237_v23, %v902_v33 }
 0x2f9   : > { %v873_v37 = vmul.f32 0.125, %v871_v34  ;;  %v903_v38 = vmul.f32 %v1236_v21, %v901_v35 }
 0x2fa   : > { %906 = vst.msk [vmem:[%s2284_s1] sm:$0xff] %vm565_vm0, %v904_v36 }
 0x2fb   : > { %v905_v39 = vadd.f32 %v1237_v23, %v903_v38  ;;  %875 = vst.msk [vmem:[%s532_s7 + $0x8] sm:$0xff] %vm565_vm0, %v873_v37 }
 0x2fc   : > { %1702 = shalt.err (!%p1699_p8)
}
 0x2fd   : > { %s1703_s9 = scalar_lea.hbm %s2290_s29, 256  ;;  %s1707_s21 = scalar_lea.hbm %s2501_s30, 2048 }
 0x2fe   : > { %p1704_p5 = scmp.ne.s32.totalorder %s2290_s29, %s1703_s9  ;;  %p1708_p12 = scmp.lt.u32.totalorder %s2290_s29, %s2501_s30 }
 0x2ff   : > { %p1709_p2 = scmp.lt.u32.totalorder %s1707_s21, %s1703_s9  ;;  %p1711_p11 = scmp.lt.u32.totalorder %s1703_s9, %s2290_s29 }
 0x300   : > { %p1705_p4 = pnand %p1704_p5, %p2504_p1 }
 0x301   : > { %p1710_p9 = por %p1709_p2, %p1708_p12 }
 0x302   : > { %p1706_p10 = pneg %p1705_p4 }
 0x303   : > { %p1712_p0 = por %p1711_p11, %p1710_p9 }
 0x305   : > { %p1713_p7 = pnand %p1712_p0, %p1706_p10 }
 0x307   : > { %1716 = shalt.err (!%p1713_p7)
}
 0x308   : > { %s1854_s16 = smov 128   ;;  %s1855_s23 = smov 8   ;;  %907 = vst.msk [vmem:[%s2284_s1 + $0x8] sm:$0xff] %vm565_vm0, %v905_v39 }
 0x309   : > { %1408 = dma.vmem_to_hbm [thread:$0]  (%p2504_p1), %s2292_s8, 256, %s2290_s29, %s911_s3, %s1854_s16, %s1854_s16, %s1855_s23  }
 0x30a   : > { %s2340_s17 = scalar_lea.sflag [#allocation15], %s465_s25  ;;  %s1717_s9 = scalar_lea.vmem %s2301_s10, 256 }
 0x30b   : > { %p1718_p13 = scmp.ne.s32.totalorder %s2301_s10, %s1717_s9  ;;  %s1856_s7 = smov [#allocation14]  }
 0x30c   : > { %s1721_s28 = sshll.u32 %s1856_s7, 4  ;;  %s1722_s28 = int_to_ptr.vmem [resolvable:$false] %s1721_s28 }
 0x30d   : > { %p1719_p3 = pnand %p1718_p13, %p2504_p1  ;;  %s1723_s21 = scalar_lea.vmem %s1722_s28, 512 }
 0x30e   : > { %p1724_p8 = scmp.lt.s32.totalorder %s2301_s10, %s1722_s28  ;;  %p1725_p5 = scmp.lt.s32.totalorder %s1723_s21, %s1717_s9 }
 0x30f   : > { %p1720_p6 = pneg %p1719_p3 }
 0x310   : > { %p1726_p4 = por %p1725_p5, %p1724_p8 }
 0x312   : > { %p1727_p10 = pnand %p1726_p4, %p1720_p6 }
 0x314   : > { %1730 = shalt.err (!%p1727_p10)
}
 0x315   : > { %s1731_s19 = scalar_lea.hbm %s2299_s22, 256  ;;  %s1735_s8 = scalar_lea.hbm %s2502_s11, 2048 }
 0x316   : > { %p1732_p12 = scmp.ne.s32.totalorder %s2299_s22, %s1731_s19  ;;  %p1736_p11 = scmp.lt.u32.totalorder %s2299_s22, %s2502_s11 }
 0x317   : > { %p1737_p0 = scmp.lt.u32.totalorder %s1735_s8, %s1731_s19  ;;  %p1739_p13 = scmp.lt.u32.totalorder %s1731_s19, %s2299_s22 }
 0x318   : > { %p1733_p2 = pnand %p1732_p12, %p2504_p1 }
 0x319   : > { %p1738_p7 = por %p1737_p0, %p1736_p11 }
 0x31a   : > { %p1734_p9 = pneg %p1733_p2 }
 0x31b   : > { %p1740_p3 = por %p1739_p13, %p1738_p7 }
 0x31d   : > { %p1741_p6 = pnand %p1740_p3, %p1734_p9 }
 0x31f   : > { %1744 = shalt.err (!%p1741_p6)
}
 0x320   : > { %1409 = dma.vmem_to_hbm [thread:$0]  (%p2504_p1), %s2301_s10, 256, %s2299_s22, %s2340_s17, %s1854_s16, %s1854_s16, %s1855_s23  }
 0x321   : > { %s1745_s3 = scalar_lea.vmem %s2278_s12, 256  ;;  %s1857_s26 = smov [#allocation16]  }
 0x322   : > { %p1746_p8 = scmp.ne.s32.totalorder %s2278_s12, %s1745_s3  ;;  %s1749_s18 = sshll.u32 %s1857_s26, 4  ;;  %s1750_s18 = int_to_ptr.vmem [resolvable:$false] %s1749_s18 }
 0x323   : > { %s1751_s9 = scalar_lea.vmem %s1750_s18, 512  ;;  %p1752_p10 = scmp.lt.s32.totalorder %s2278_s12, %s1750_s18 }
 0x324   : > { %p1747_p5 = pnand %p1746_p8, %p2504_p1  ;;  %p1753_p12 = scmp.lt.s32.totalorder %s1751_s9, %s1745_s3 }
 0x326   : > { %p1748_p4 = pneg %p1747_p5  ;;  %p1754_p2 = por %p1753_p12, %p1752_p10 }
 0x328   : > { %p1755_p9 = pnand %p1754_p2, %p1748_p4 }
 0x32a   : > { %1758 = shalt.err (!%p1755_p9)
}
 0x32b   : > { %s1759_s10 = scalar_lea.hbm %s2307_s24, 256  ;;  %s1763_s28 = scalar_lea.hbm %s2503_s27, 2048 }
 0x32c   : > { %p1760_p11 = scmp.ne.s32.totalorder %s2307_s24, %s1759_s10  ;;  %p1764_p13 = scmp.lt.u32.totalorder %s2307_s24, %s2503_s27 }
 0x32d   : > { %p1765_p3 = scmp.lt.u32.totalorder %s1763_s28, %s1759_s10  ;;  %p1767_p8 = scmp.lt.u32.totalorder %s1759_s10, %s2307_s24 }
 0x32e   : > { %p1761_p0 = pnand %p1760_p11, %p2504_p1 }
 0x32f   : > { %p1766_p6 = por %p1765_p3, %p1764_p13 }
 0x330   : > { %p1762_p7 = pneg %p1761_p0 }
 0x331   : > { %p1768_p5 = por %p1767_p8, %p1766_p6 }
 0x333   : > { %p1769_p4 = pnand %p1768_p5, %p1762_p7 }
 0x335   : > { %1772 = shalt.err (!%p1769_p4)
}
 0x336   : > { %1410 = dma.vmem_to_hbm [thread:$0]  (%p2504_p1), %s2278_s12, 256, %s2307_s24, %s2340_s17, %s1854_s16, %s1854_s16, %s1855_s23  }
 0x337 PF: > { %s2505_s13 = sld [smem:[#allocation26_spill]]  ;;  %s2506_s25 = sld [smem:[#allocation23_spill]] }
 0x338   : > { %s2507_s8 = sld [smem:[#allocation28_spill]] }
 0x33d   : > { %p1451_p10 = scmp.ge.s32.totalorder %s2505_s13, 2  ;;  %s987_s1 = sand.u32 1, %s2506_s25  }
 0x33e   : > { %p2508_p12 = scmp.ne.s32.totalorder %s2507_s8, 0  ;;  %s988_s29 = scalar_lea.sflag [#allocation4], %s987_s1 }
 0x340   : > { %p1435_p2 = pnand %p1451_p10, %p2508_p12 }
 0x342   : > { %1814 = dma.done.wait (!%p1435_p2), %s988_s29, 256  }
 0x343   : > { %1816 = vsyncadd (!%p1435_p2), %s988_s29, 4294967040  ;;  %s2509_s20 = sadd.s32 4294967294, %s2505_s13  }
 0x344   : > { %s996_s3 = sand.u32 1, %s2509_s20  }
 0x345   : > { %s997_s26 = scalar_lea.sflag [#allocation15], %s996_s3 }
 0x346   : > { %1818 = dma.done.wait (!%p1435_p2), %s997_s26, 512  }
 0x347   : > { %1820 = vsyncadd (!%p1435_p2), %s997_s26, 4294966784  ;;  %s35_s18 = sadd.s32 1, %s2505_s13   ;;  %s2510_s12 = sld [smem:[#allocation30_spill]] }
 0x348   : > { %p32_p1 = scmp.ge.s32.totalorder %s35_s18, 10   ;;  %s2511_s16 = sld [smem:[#allocation25_spill]] }
 0x349   : > { %s2512_s17 = sld [smem:[#allocation29_spill]]  ;;  %s2513_s13 = smov %s1827_s14 }
 0x34a   : > { %s2514_s14 = smov %s1831_s15  ;;  %34 = sbr.rel (!%p32_p1) target bundleno = 19 (0x13), region = 165 }
 0x34d   : > { %s2515_s15 = smov %s2510_s12 }
 0x351   :  { %1011 = vsyncpa [#allocation3], 1 }
 0x352   :  { %1013 = vsyncpa [#allocation3 + $0x1], 1 }
 0x353   :  { %1014 = vsyncpa [#allocation6], 1 }
 0x354   :  { %1016 = vsyncpa [#allocation6 + $0x1], 1 }
 0x355   :  { %1017 = vsyncpa [#allocation9], 1 }
 0x356   :  { %1018 = vsyncpa [#allocation12], 1 }
 0x357   :  { %1019 = vsyncpa [#allocation4], 1 }
 0x358   :  { %1021 = vsyncpa [#allocation4 + $0x1], 1 }
 0x359   :  { %1022 = vsyncpa [#allocation15], 1 }
 0x35a   :  { %1024 = vsyncpa [#allocation15 + $0x1], 1 }

</bundles_post_ra>
